<compile_context>
chip_gen: v7x
topology: tpu7x:2x2x1
jax: 0.10.0
libtpu: 0.0.40
codegen_flags: <defaults>
</compile_context>

<pallas_src>
import functools

import jax
import jax.numpy as jnp
from jax.experimental import pallas as pl
from jax.experimental.pallas import tpu as pltpu

KERNEL_SIZES = (7, 12, 14, 24, 48)  # module default


def _shift_down(v, o):
    """result[t] = v[t-o] for t >= o, else 0. `o` is a static python int in (0, rows)."""
    rows = v.shape[0]
    pad = jnp.zeros((o,) + v.shape[1:], v.dtype)
    return jnp.concatenate([pad, v[: rows - o]], axis=0)


def _decomp_kernel(w_ref, b_ref, x_ref, mean_ref, res_ref, *, kernel_sizes):
    """w_ref / b_ref: SMEM (K,) f32 params of Linear(1, K).
    x_ref: VMEM (L, TC) block — time on sublanes, channels on lanes.
    mean_ref / res_ref: VMEM (L, TC) outputs."""
    x = x_ref[...].astype(jnp.float32)              # (L, TC), matches x.float()
    L, TC = x.shape
    K = len(kernel_sizes)

    pads = [((k - 1) - (k - 1) // 2, (k - 1) // 2) for k in kernel_sizes]
    pf_max = max(p for p, _ in pads)
    pe_max = max(p for _, p in pads)

    x0 = x[0:1, :]                                  # (1, TC) front replicate value / baseline
    xL = x[L - 1:L, :]                              # (1, TC) end replicate value

    # Replicate-padded, baseline-removed series with one leading zero row:
    #   xp = [0] ++ [x0 - x0] * pf_max ++ (x - x0) ++ [xL - x0] * pe_max
    # The front-pad rows are exactly zero, so they fold into the leading zero block.
    xc = x - x0                                     # (L, TC)
    head = jnp.zeros((1 + pf_max, TC), jnp.float32)
    tail = jnp.broadcast_to(xL - x0, (pe_max, TC))
    xp = jnp.concatenate([head, xc, tail], axis=0)  # (Lp, TC)
    Lp = 1 + pf_max + L + pe_max

    # Inclusive prefix sum along time (Hillis-Steele, log2(Lp) shifted adds).
    # After the scan, S[i] = sum of the padded (baseline-removed) series over indices [0, i).
    S = xp
    o = 1
    while o < Lp:
        S = S + _shift_down(S, o)
        o *= 2

    # Softmax logits of Linear(1, K): computed once, kept live (max + exp share them).
    logits = [x * w_ref[j] + b_ref[j] for j in range(K)]
    m = logits[0]
    for j in range(1, K):
        m = jnp.maximum(m, logits[j])

    # Fused K pass: window average from two static shifted prefix-sum reads + softmax accum.
    num = jnp.zeros((L, TC), jnp.float32)
    den = jnp.zeros((L, TC), jnp.float32)
    for j, k in enumerate(kernel_sizes):
        pf, _ = pads[j]
        lo = pf_max - pf                            # padded index of the window start at t=0
        hi = lo + k
        win = (S[hi:hi + L] - S[lo:lo + L]) * (1.0 / k) + x0
        e = jnp.exp(logits[j] - m)
        num = num + win * e
        den = den + e

    mean = num / den
    mean_ref[...] = mean.astype(mean_ref.dtype)
    res_ref[...] = (x - mean).astype(res_ref.dtype)


def _vmem_budget():
    """(vmem_limit_bytes, max input-block elements) — generation-aware with a safe fallback."""
    try:
        cap = getattr(pltpu.get_tpu_info(), "vmem_capacity_bytes", None)
    except Exception:
        cap = None
    if cap is not None and cap >= 100 * 1024 * 1024:   # v5e / v6e: 128 MiB VMEM per core
        return 80 * 1024 * 1024, 512 * 1024
    return 40 * 1024 * 1024, 256 * 1024                # v7x (64 MiB / TC) or unknown


def _pick_lane_tile(B, L, C, max_block_elems):
    """Channel tile: multiple of 128 dividing C when possible, else the full channel dim."""
    if C % 128 != 0:
        return C        # full-dim block is exempt from the (8,128) divisibility rule
    cands = [t for t in range(128, C + 1, 128) if C % t == 0]
    fitting = [t for t in cands if L * t <= max_block_elems] or [128]
    tc = max(fitting)
    if B * (C // tc) < 2:   # keep >= 2 grid steps so both v7x TensorCores get work
        smaller = [t for t in fitting if C // t >= 2]
        if smaller:
            tc = max(smaller)
    return tc


def series_decomp_multi(x, weight, bias, kernel_sizes=KERNEL_SIZES, out_dtype=jnp.float32):
    """x: (B, L, C) in its native dtype. weight/bias: (K,) float32 from Linear(1, K).
    Returns (moving_mean, res), each (B, L, C) in out_dtype (default float32, matching torch)."""
    B, L, C = x.shape
    vmem_limit, max_block_elems = _vmem_budget()
    TC = _pick_lane_tile(B, L, C, max_block_elems)
    grid = (B, C // TC)

    w = jnp.asarray(weight, jnp.float32).reshape(-1)
    b = jnp.asarray(bias, jnp.float32).reshape(-1)

    kern = functools.partial(_decomp_kernel, kernel_sizes=tuple(kernel_sizes))
    blk = pl.BlockSpec((None, L, TC), lambda bi, ci: (bi, 0, ci))
    out_shape = (
        jax.ShapeDtypeStruct((B, L, C), out_dtype),
        jax.ShapeDtypeStruct((B, L, C), out_dtype),
    )
    mean, res = pl.pallas_call(
        kern,
        out_shape=out_shape,
        grid=grid,
        in_specs=[
            pl.BlockSpec(memory_space=pltpu.MemorySpace.SMEM),   # weight (K,)
            pl.BlockSpec(memory_space=pltpu.MemorySpace.SMEM),   # bias   (K,)
            blk,                                                 # x (B, L, C)
        ],
        out_specs=(blk, blk),                                    # moving_mean, res
        compiler_params=pltpu.CompilerParams(
            dimension_semantics=("parallel", "parallel"),
            vmem_limit_bytes=vmem_limit,
        ),
    )(w, b, x)
    return mean, res


def _reference(x, weight, bias, kernel_sizes=KERNEL_SIZES):
    """Pure-JAX reference mirroring the PyTorch forward."""
    x = x.astype(jnp.float32)
    B, L, C = x.shape
    movings = []
    for k in kernel_sizes:
        pf = (k - 1) - (k - 1) // 2
        pe = (k - 1) // 2
        xp = jnp.concatenate(
            [jnp.repeat(x[:, :1], pf, axis=1), x, jnp.repeat(x[:, -1:], pe, axis=1)],
            axis=1,
        )
        win = sum(xp[:, i:i + L] for i in range(k)) / k
        movings.append(win)
    mm = jnp.stack(movings, axis=-1)                               # (B, L, C, K)
    logits = x[..., None] * weight[None, None, None, :] + bias     # Linear(1, K)
    w = jax.nn.softmax(logits, axis=-1)
    mean = jnp.sum(mm * w, axis=-1)
    return mean, x - mean


if __name__ == "__main__":
    key = jax.random.PRNGKey(0)
    kx, kw, kb = jax.random.split(key, 3)

    B, L, C = 2, 16, 4
    K = len(KERNEL_SIZES)

    x = jax.random.normal(kx, (B, L, C), dtype=jnp.float32)
    # Linear(1, K): weight (K, 1) ~ U(-1, 1), bias (K,) ~ U(-1, 1)  (fan_in = 1)
    weight = jax.random.uniform(kw, (K,), minval=-1.0, maxval=1.0, dtype=jnp.float32)
    bias = jax.random.uniform(kb, (K,), minval=-1.0, maxval=1.0, dtype=jnp.float32)

    mean, res = series_decomp_multi(x, weight, bias)
    jax.block_until_ready((mean, res))

    ref_mean, ref_res = _reference(x, weight, bias)
    assert jnp.allclose(mean, ref_mean, atol=2e-5, rtol=1e-5), "moving_mean mismatch"
    assert jnp.allclose(res, ref_res, atol=2e-5, rtol=1e-5), "res mismatch"

    print("KERNEL_OK")
</pallas_src>

<mosaic_0001>
module attributes {stable_mosaic.version = 11 : i64} {
  func.func @_decomp_kernel(%arg0: i32, %arg1: i32, %arg2: memref<5xf32, #tpu.memory_space<smem>>, %arg3: memref<5xf32, #tpu.memory_space<smem>>, %arg4: memref<1x16x4xf32, #tpu.memory_space<vmem>>, %arg5: memref<1x16x4xf32, #tpu.memory_space<vmem>>, %arg6: memref<1x16x4xf32, #tpu.memory_space<vmem>>) attributes {dimension_semantics = [#tpu.dimension_semantics<parallel>, #tpu.dimension_semantics<parallel>], iteration_bounds = array<i64: 2, 1>, scalar_prefetch = 0 : i64, scratch_operands = 0 : i64, tpu.core_type = #tpu.core_type<tc>, window_params = [{transform_indices = @transform_0, window_bounds = array<i64: 5>}, {transform_indices = @transform_1, window_bounds = array<i64: 5>}, {transform_indices = @transform_2, window_bounds = array<i64: 1, 16, 4>}, {transform_indices = @transform_3, window_bounds = array<i64: 1, 16, 4>}, {transform_indices = @transform_4, window_bounds = array<i64: 1, 16, 4>}]} {
    %c0 = arith.constant 0 : index
    %c0_0 = arith.constant 0 : index
    %c0_1 = arith.constant 0 : index
    %0 = vector.load %arg4[%c0, %c0_0, %c0_1] : memref<1x16x4xf32, #tpu.memory_space<vmem>>, vector<1x16x4xf32>
    %1 = vector.shape_cast %0 : vector<1x16x4xf32> to vector<16x4xf32>
    %2 = vector.extract_strided_slice %1 {offsets = [0, 0], sizes = [1, 4], strides = [1, 1]} : vector<16x4xf32> to vector<1x4xf32>
    %3 = vector.extract_strided_slice %1 {offsets = [15, 0], sizes = [1, 4], strides = [1, 1]} : vector<16x4xf32> to vector<1x4xf32>
    %4 = vector.broadcast %2 : vector<1x4xf32> to vector<16x4xf32>
    %5 = arith.subf %1, %4 : vector<16x4xf32>
    %cst = arith.constant 0.000000e+00 : f32
    %6 = vector.broadcast %cst : f32 to vector<25x4xf32>
    %7 = arith.subf %3, %2 : vector<1x4xf32>
    %8 = vector.shape_cast %7 : vector<1x4xf32> to vector<1x4xf32>
    %9 = vector.broadcast %8 : vector<1x4xf32> to vector<23x4xf32>
    %10 = tpu.concatenate %6, %5, %9 in 0 : vector<25x4xf32>, vector<16x4xf32>, vector<23x4xf32> -> vector<64x4xf32>
    %cst_2 = arith.constant 0.000000e+00 : f32
    %11 = vector.broadcast %cst_2 : f32 to vector<1x4xf32>
    %12 = vector.extract_strided_slice %10 {offsets = [0, 0], sizes = [63, 4], strides = [1, 1]} : vector<64x4xf32> to vector<63x4xf32>
    %13 = tpu.concatenate %11, %12 in 0 : vector<1x4xf32>, vector<63x4xf32> -> vector<64x4xf32>
    %14 = arith.addf %10, %13 : vector<64x4xf32>
    %cst_3 = arith.constant 0.000000e+00 : f32
    %15 = vector.broadcast %cst_3 : f32 to vector<2x4xf32>
    %16 = vector.extract_strided_slice %14 {offsets = [0, 0], sizes = [62, 4], strides = [1, 1]} : vector<64x4xf32> to vector<62x4xf32>
    %17 = tpu.concatenate %15, %16 in 0 : vector<2x4xf32>, vector<62x4xf32> -> vector<64x4xf32>
    %18 = arith.addf %14, %17 : vector<64x4xf32>
    %cst_4 = arith.constant 0.000000e+00 : f32
    %19 = vector.broadcast %cst_4 : f32 to vector<4x4xf32>
    %20 = vector.extract_strided_slice %18 {offsets = [0, 0], sizes = [60, 4], strides = [1, 1]} : vector<64x4xf32> to vector<60x4xf32>
    %21 = tpu.concatenate %19, %20 in 0 : vector<4x4xf32>, vector<60x4xf32> -> vector<64x4xf32>
    %22 = arith.addf %18, %21 : vector<64x4xf32>
    %cst_5 = arith.constant 0.000000e+00 : f32
    %23 = vector.broadcast %cst_5 : f32 to vector<8x4xf32>
    %24 = vector.extract_strided_slice %22 {offsets = [0, 0], sizes = [56, 4], strides = [1, 1]} : vector<64x4xf32> to vector<56x4xf32>
    %25 = tpu.concatenate %23, %24 in 0 : vector<8x4xf32>, vector<56x4xf32> -> vector<64x4xf32>
    %26 = arith.addf %22, %25 : vector<64x4xf32>
    %cst_6 = arith.constant 0.000000e+00 : f32
    %27 = vector.broadcast %cst_6 : f32 to vector<16x4xf32>
    %28 = vector.extract_strided_slice %26 {offsets = [0, 0], sizes = [48, 4], strides = [1, 1]} : vector<64x4xf32> to vector<48x4xf32>
    %29 = tpu.concatenate %27, %28 in 0 : vector<16x4xf32>, vector<48x4xf32> -> vector<64x4xf32>
    %30 = arith.addf %26, %29 : vector<64x4xf32>
    %cst_7 = arith.constant 0.000000e+00 : f32
    %31 = vector.broadcast %cst_7 : f32 to vector<32x4xf32>
    %32 = vector.extract_strided_slice %30 {offsets = [0, 0], sizes = [32, 4], strides = [1, 1]} : vector<64x4xf32> to vector<32x4xf32>
    %33 = tpu.concatenate %31, %32 in 0 : vector<32x4xf32>, vector<32x4xf32> -> vector<64x4xf32>
    %34 = arith.addf %30, %33 : vector<64x4xf32>
    %c0_8 = arith.constant 0 : index
    %35 = memref.load %arg2[%c0_8] : memref<5xf32, #tpu.memory_space<smem>>
    %36 = vector.broadcast %35 : f32 to vector<16x4xf32>
    %37 = arith.mulf %1, %36 : vector<16x4xf32>
    %c0_9 = arith.constant 0 : index
    %38 = memref.load %arg3[%c0_9] : memref<5xf32, #tpu.memory_space<smem>>
    %39 = vector.broadcast %38 : f32 to vector<16x4xf32>
    %40 = arith.addf %37, %39 : vector<16x4xf32>
    %c1 = arith.constant 1 : index
    %41 = memref.load %arg2[%c1] : memref<5xf32, #tpu.memory_space<smem>>
    %42 = vector.broadcast %41 : f32 to vector<16x4xf32>
    %43 = arith.mulf %1, %42 : vector<16x4xf32>
    %c1_10 = arith.constant 1 : index
    %44 = memref.load %arg3[%c1_10] : memref<5xf32, #tpu.memory_space<smem>>
    %45 = vector.broadcast %44 : f32 to vector<16x4xf32>
    %46 = arith.addf %43, %45 : vector<16x4xf32>
    %c2 = arith.constant 2 : index
    %47 = memref.load %arg2[%c2] : memref<5xf32, #tpu.memory_space<smem>>
    %48 = vector.broadcast %47 : f32 to vector<16x4xf32>
    %49 = arith.mulf %1, %48 : vector<16x4xf32>
    %c2_11 = arith.constant 2 : index
    %50 = memref.load %arg3[%c2_11] : memref<5xf32, #tpu.memory_space<smem>>
    %51 = vector.broadcast %50 : f32 to vector<16x4xf32>
    %52 = arith.addf %49, %51 : vector<16x4xf32>
    %c3 = arith.constant 3 : index
    %53 = memref.load %arg2[%c3] : memref<5xf32, #tpu.memory_space<smem>>
    %54 = vector.broadcast %53 : f32 to vector<16x4xf32>
    %55 = arith.mulf %1, %54 : vector<16x4xf32>
    %c3_12 = arith.constant 3 : index
    %56 = memref.load %arg3[%c3_12] : memref<5xf32, #tpu.memory_space<smem>>
    %57 = vector.broadcast %56 : f32 to vector<16x4xf32>
    %58 = arith.addf %55, %57 : vector<16x4xf32>
    %c4 = arith.constant 4 : index
    %59 = memref.load %arg2[%c4] : memref<5xf32, #tpu.memory_space<smem>>
    %60 = vector.broadcast %59 : f32 to vector<16x4xf32>
    %61 = arith.mulf %1, %60 : vector<16x4xf32>
    %c4_13 = arith.constant 4 : index
    %62 = memref.load %arg3[%c4_13] : memref<5xf32, #tpu.memory_space<smem>>
    %63 = vector.broadcast %62 : f32 to vector<16x4xf32>
    %64 = arith.addf %61, %63 : vector<16x4xf32>
    %65 = arith.maximumf %40, %46 : vector<16x4xf32>
    %66 = arith.maximumf %65, %52 : vector<16x4xf32>
    %67 = arith.maximumf %66, %58 : vector<16x4xf32>
    %68 = arith.maximumf %67, %64 : vector<16x4xf32>
    %cst_14 = arith.constant 0.000000e+00 : f32
    %69 = vector.broadcast %cst_14 : f32 to vector<16x4xf32>
    %cst_15 = arith.constant 0.000000e+00 : f32
    %70 = vector.broadcast %cst_15 : f32 to vector<16x4xf32>
    %71 = vector.extract_strided_slice %34 {offsets = [28, 0], sizes = [16, 4], strides = [1, 1]} : vector<64x4xf32> to vector<16x4xf32>
    %72 = vector.extract_strided_slice %34 {offsets = [21, 0], sizes = [16, 4], strides = [1, 1]} : vector<64x4xf32> to vector<16x4xf32>
    %73 = arith.subf %71, %72 : vector<16x4xf32>
    %cst_16 = arith.constant 0.142857149 : f32
    %74 = vector.broadcast %cst_16 : f32 to vector<16x4xf32>
    %75 = arith.mulf %73, %74 : vector<16x4xf32>
    %76 = vector.broadcast %2 : vector<1x4xf32> to vector<16x4xf32>
    %77 = arith.addf %75, %76 : vector<16x4xf32>
    %78 = arith.subf %40, %68 : vector<16x4xf32>
    %79 = math.exp %78 : vector<16x4xf32>
    %80 = arith.mulf %77, %79 : vector<16x4xf32>
    %81 = arith.addf %69, %80 : vector<16x4xf32>
    %82 = arith.addf %70, %79 : vector<16x4xf32>
    %83 = vector.extract_strided_slice %34 {offsets = [30, 0], sizes = [16, 4], strides = [1, 1]} : vector<64x4xf32> to vector<16x4xf32>
    %84 = vector.extract_strided_slice %34 {offsets = [18, 0], sizes = [16, 4], strides = [1, 1]} : vector<64x4xf32> to vector<16x4xf32>
    %85 = arith.subf %83, %84 : vector<16x4xf32>
    %cst_17 = arith.constant 0.0833333358 : f32
    %86 = vector.broadcast %cst_17 : f32 to vector<16x4xf32>
    %87 = arith.mulf %85, %86 : vector<16x4xf32>
    %88 = vector.broadcast %2 : vector<1x4xf32> to vector<16x4xf32>
    %89 = arith.addf %87, %88 : vector<16x4xf32>
    %90 = arith.subf %46, %68 : vector<16x4xf32>
    %91 = math.exp %90 : vector<16x4xf32>
    %92 = arith.mulf %89, %91 : vector<16x4xf32>
    %93 = arith.addf %81, %92 : vector<16x4xf32>
    %94 = arith.addf %82, %91 : vector<16x4xf32>
    %95 = vector.extract_strided_slice %34 {offsets = [31, 0], sizes = [16, 4], strides = [1, 1]} : vector<64x4xf32> to vector<16x4xf32>
    %96 = vector.extract_strided_slice %34 {offsets = [17, 0], sizes = [16, 4], strides = [1, 1]} : vector<64x4xf32> to vector<16x4xf32>
    %97 = arith.subf %95, %96 : vector<16x4xf32>
    %cst_18 = arith.constant 0.0714285746 : f32
    %98 = vector.broadcast %cst_18 : f32 to vector<16x4xf32>
    %99 = arith.mulf %97, %98 : vector<16x4xf32>
    %100 = vector.broadcast %2 : vector<1x4xf32> to vector<16x4xf32>
    %101 = arith.addf %99, %100 : vector<16x4xf32>
    %102 = arith.subf %52, %68 : vector<16x4xf32>
    %103 = math.exp %102 : vector<16x4xf32>
    %104 = arith.mulf %101, %103 : vector<16x4xf32>
    %105 = arith.addf %93, %104 : vector<16x4xf32>
    %106 = arith.addf %94, %103 : vector<16x4xf32>
    %107 = vector.extract_strided_slice %34 {offsets = [36, 0], sizes = [16, 4], strides = [1, 1]} : vector<64x4xf32> to vector<16x4xf32>
    %108 = vector.extract_strided_slice %34 {offsets = [12, 0], sizes = [16, 4], strides = [1, 1]} : vector<64x4xf32> to vector<16x4xf32>
    %109 = arith.subf %107, %108 : vector<16x4xf32>
    %cst_19 = arith.constant 0.0416666679 : f32
    %110 = vector.broadcast %cst_19 : f32 to vector<16x4xf32>
    %111 = arith.mulf %109, %110 : vector<16x4xf32>
    %112 = vector.broadcast %2 : vector<1x4xf32> to vector<16x4xf32>
    %113 = arith.addf %111, %112 : vector<16x4xf32>
    %114 = arith.subf %58, %68 : vector<16x4xf32>
    %115 = math.exp %114 : vector<16x4xf32>
    %116 = arith.mulf %113, %115 : vector<16x4xf32>
    %117 = arith.addf %105, %116 : vector<16x4xf32>
    %118 = arith.addf %106, %115 : vector<16x4xf32>
    %119 = vector.extract_strided_slice %34 {offsets = [48, 0], sizes = [16, 4], strides = [1, 1]} : vector<64x4xf32> to vector<16x4xf32>
    %120 = vector.extract_strided_slice %34 {offsets = [0, 0], sizes = [16, 4], strides = [1, 1]} : vector<64x4xf32> to vector<16x4xf32>
    %121 = arith.subf %119, %120 : vector<16x4xf32>
    %cst_20 = arith.constant 0.020833334 : f32
    %122 = vector.broadcast %cst_20 : f32 to vector<16x4xf32>
    %123 = arith.mulf %121, %122 : vector<16x4xf32>
    %124 = vector.broadcast %2 : vector<1x4xf32> to vector<16x4xf32>
    %125 = arith.addf %123, %124 : vector<16x4xf32>
    %126 = arith.subf %64, %68 : vector<16x4xf32>
    %127 = math.exp %126 : vector<16x4xf32>
    %128 = arith.mulf %125, %127 : vector<16x4xf32>
    %129 = arith.addf %117, %128 : vector<16x4xf32>
    %130 = arith.addf %118, %127 : vector<16x4xf32>
    %131 = arith.divf %129, %130 : vector<16x4xf32>
    %c0_21 = arith.constant 0 : index
    %c0_22 = arith.constant 0 : index
    %c0_23 = arith.constant 0 : index
    %132 = vector.load %arg5[%c0_21, %c0_22, %c0_23] : memref<1x16x4xf32, #tpu.memory_space<vmem>>, vector<1x16x4xf32>
    %133 = vector.shape_cast %132 : vector<1x16x4xf32> to vector<16x4xf32>
    %134 = vector.shape_cast %131 : vector<16x4xf32> to vector<1x16x4xf32>
    tpu.vector_store %arg5[%c0_21, %c0_22, %c0_23], %134 {strides = array<i32>} : memref<1x16x4xf32, #tpu.memory_space<vmem>>, vector<1x16x4xf32>,
    %135 = arith.subf %1, %131 : vector<16x4xf32>
    %c0_24 = arith.constant 0 : index
    %c0_25 = arith.constant 0 : index
    %c0_26 = arith.constant 0 : index
    %136 = vector.load %arg6[%c0_24, %c0_25, %c0_26] : memref<1x16x4xf32, #tpu.memory_space<vmem>>, vector<1x16x4xf32>
    %137 = vector.shape_cast %136 : vector<1x16x4xf32> to vector<16x4xf32>
    %138 = vector.shape_cast %135 : vector<16x4xf32> to vector<1x16x4xf32>
    tpu.vector_store %arg6[%c0_24, %c0_25, %c0_26], %138 {strides = array<i32>} : memref<1x16x4xf32, #tpu.memory_space<vmem>>, vector<1x16x4xf32>,
    return
  }
  func.func @transform_0(%arg0: i32, %arg1: i32) -> i32 {
    %c0_i32 = arith.constant 0 : i32
    %c0_i32_0 = arith.constant 0 : i32
    return %c0_i32 : i32
  }
  func.func @transform_1(%arg0: i32, %arg1: i32) -> i32 {
    %c0_i32 = arith.constant 0 : i32
    %c0_i32_0 = arith.constant 0 : i32
    return %c0_i32 : i32
  }
  func.func @transform_2(%arg0: i32, %arg1: i32) -> (i32, i32, i32) {
    %c0_i32 = arith.constant 0 : i32
    %c0_i32_0 = arith.constant 0 : i32
    return %arg0, %c0_i32, %arg1 : i32, i32, i32
  }
  func.func @transform_3(%arg0: i32, %arg1: i32) -> (i32, i32, i32) {
    %c0_i32 = arith.constant 0 : i32
    %c0_i32_0 = arith.constant 0 : i32
    return %arg0, %c0_i32, %arg1 : i32, i32, i32
  }
  func.func @transform_4(%arg0: i32, %arg1: i32) -> (i32, i32, i32) {
    %c0_i32 = arith.constant 0 : i32
    %c0_i32_0 = arith.constant 0 : i32
    return %arg0, %c0_i32, %arg1 : i32, i32, i32
  }
}

</mosaic_0001>

<bundles_post_ra>
// kernel: tpu_custom_call.1
= control target key start
LH: loop header
LB: loop body
LE: loop exit
PB: predicated region body
PF: predicated region fallthrough
CT: control target
= control target key end

     0   :  { %10 = vsyncpa [#allocation3], 0  ;;  %s1387_s0 = inlined_call_operand.vmem [shape: f32[5], index: 0, kind: input, shape index: {}]   ;;  %s1388_s1 = inlined_call_operand.vmem [shape: f32[5], index: 1, kind: input, shape index: {}]   ;;  %s1389_s2 = inlined_call_operand.vmem [shape: f32[2,16,4], index: 2, kind: input, shape index: {}]   ;;  %s1390_s3 = inlined_call_operand.vmem [shape: f32[2,16,4], index: 3, kind: output, shape index: {0}]   ;;  %s1391_s4 = inlined_call_operand.vmem [shape: f32[2,16,4], index: 4, kind: output, shape index: {1}]  }
   0x1   :  { %11 = vsyncpa [#allocation5], 0  ;;  %s1066_s15 = smov 0   ;;  %s1068_s16 = smov 0  }
   0x2   :  { %s1070_s17 = smov 0  }
   0x3 LB: > { %s876_s18 = sadd.s32 4294967295, %s1036_s17   ;;  %s29_s19 = sadd.s32 1, %s1032_s16  ;;  %s1036_s17 = sphi %s1070_s17, %s17_s17   ;;  %s1032_s16 = sphi %s1068_s16, %s1401_s16   ;;  %s1028_s15 = sphi %s1066_s15, %s1400_s15  }
   0x4   : > { %p31_p0 = scmp.ge.s32.totalorder %s29_s19, 2  ;;  %p878_p1 = scmp.ge.s32.totalorder %s1036_s17, 1 }
   0x5   : > { %p160_p2 = scmp.lt.s32.totalorder %s1036_s17, 3  ;;  %p1091_p4 = scmp.eq.s32.totalorder %s876_s18, 0 }
   0x6   : > { %s1403_s19 = smov (%p31_p0, %s29_s19), 0  ;;  %s173_s24 = sshll.u32 %s1387_s0, 4  ;;  %s174_s24 = int_to_ptr.vmem [resolvable:$true] %s173_s24 }
   0x7   : > { %p1087_p3 = pnand %p878_p1, %p160_p2  ;;  %s184_s27 = sshll.u32 %s1388_s1, 4  ;;  %s185_s27 = int_to_ptr.vmem [resolvable:$true] %s184_s27 }
   0x8   : > { %s1396_s21 = scalar_select %p1091_p4, 1, 0 }
   0x9   : > { %s1395_s20 = scalar_select %p1087_p3, 1, 0 }
   0xa   : > { %p912_p5 = pneg %p1087_p3  ;;  %s976_s29 = scalar_lea.vmem %s174_s24, 16 }
   0xb   : > { %p977_p7 = scmp.ne.s32.totalorder %s174_s24, %s976_s29  ;;  %p984_p11 = scmp.lt.s32.totalorder %s174_s24, %s174_s24 }
   0xc   : > { %p1105_p6 = pnand %p1091_p4, %p912_p5  ;;  %p985_p12 = scmp.lt.s32.totalorder %s976_s29, %s976_s29 }
   0xe   : > { %p978_p8 = pneg %p1105_p6  ;;  %p986_p13 = por %p985_p12, %p984_p11 }
  0x10   : > { %p979_p9 = pnand %p978_p8, %p977_p7 }
  0x12   : > { %p980_p10 = pneg %p979_p9 }
  0x14   : > { %p987_p0 = pnand %p986_p13, %p980_p10 }
  0x16   : > { %990 = shalt.err (!%p987_p0)
}
  0x17   : > { %s1038_s30 = smov [#allocation2]   ;;  %s991_s5 = scalar_lea.vmem %s185_s27, 16 }
  0x18   : > { %915 = dma.vmem_to_smem (!%p1105_p6), %s174_s24, 16, %s1038_s30, [#allocation3]  }
  0x19   : > { %p992_p1 = scmp.ne.s32.totalorder %s185_s27, %s991_s5  ;;  %p999_p4 = scmp.lt.s32.totalorder %s185_s27, %s185_s27 }
  0x1a   : > { %p1000_p3 = scmp.lt.s32.totalorder %s991_s5, %s991_s5 }
  0x1b   : > { %p994_p2 = pnand %p992_p1, %p978_p8 }
  0x1c   : > { %p1001_p7 = por %p1000_p3, %p999_p4 }
  0x1d   : > { %p995_p5 = pneg %p994_p2 }
  0x1f   : > { %p1002_p9 = pnand %p1001_p7, %p995_p5 }
  0x21   : > { %1005 = shalt.err (!%p1002_p9)
}
  0x22   : > { %s1039_s6 = smov [#allocation4]   ;;  %p1398_p10 = scmp.ne.s32.totalorder %s1395_s20, 0 }
  0x23   : > { %918 = dma.vmem_to_smem (!%p1105_p6), %s185_s27, 16, %s1039_s6, [#allocation5]  }
  0x24   : > { %208 = sbr.rel (%p1398_p10) target bundleno = 141 (0x8d), region = 32  ;;  %p1399_p11 = scmp.ne.s32.totalorder (!%p1398_p10), %s1396_s21, 0 }
  0x2b   : > { %1019 = dma.done.wait (%p1399_p11), [#allocation3], 16  }
  0x2c   : > { %1021 = vsyncadd (%p1399_p11), [#allocation3], 4294967280 }
  0x2d   : > { %1023 = dma.done.wait (%p1399_p11), [#allocation5], 16  }
  0x2e   : > { %1025 = vsyncadd (%p1399_p11), [#allocation5], 4294967280 }
  0x2f   : > { %218 = sfence }
  0x30   : > { %p253_p3 = scmp.lt.s32.totalorder %s1028_s15, 1  ;;  %v279_v0 = vlaneseq  ;;  %v1040_v1 = vmov 0.0   ;;  %s1126_s7 = sld [smem:[#allocation2]]  ;;  %vm295_vm0 = vcmask 1040384   ;;  %vm341_vm1 = vcmask 1041408  }
  0x31   : > { %v308_v2 = vrot.slane %v1040_v1, 7  ;;  %s1148_s12 = sld [smem:[#allocation4]]  ;;  %s1161_s13 = sld [smem:[#allocation2 + $0x1]]  ;;  %vm381_vm2 = vcmask 1043456   ;;  %vm489_vm3 = vcmask 1046528   ;;  %vm554_vm4 = vcmask 1045504  }
  0x32   : > { %s1405_s15 = smov (!%p253_p3, %s1028_s15), 1  ;;  %v280_v3 = vshrl.u32 %v279_v0, 7  ;;  %s1165_s14 = sld [smem:[#allocation2 + $0x2]]  ;;  %vm617_vm5 = vcmask 1044480   ;;  %vm703_vm6 = vcmask 31748   ;;  %vm705_vm7 = vcmask 31744  }
  0x33   : > { %v326_v4 = vsel %vm295_vm0, 0.0, %v308_v2  ;;  %v1130_v5 = vrot.slane %v308_v2, 6  ;;  %s1132_s8 = sshll.u32 %s1405_s15, 4  ;;  %s1180_s15 = sld [smem:[#allocation4 + $0x1]]  ;;  %vm707_vm8 = vcmask 27648  }
  0x34   : > { %v281_v6 = vsub.s32 0, %v280_v3  ;;  %v342_v7 = vrot.slane %v326_v4, 6  ;;  %s260_s11 = scalar_lea.vmem %s1389_s2, %s1132_s8  ;;  %v291_v10 = vsub.s32 7, %v280_v3  ;;  %s1182_s18 = sld [smem:[#allocation4 + $0x2]] }
  0x35   : > { %v1138_v8 = vld [vmem:[%s260_s11] sm:$0xff]  ;;  %v1140_v9 = vld [vmem:[%s260_s11 + $0x8] sm:$0xff]  ;;  %v1146_v13 = vadd.f32 %v1130_v5, %v308_v2  ;;  %s1184_s20 = sld [smem:[#allocation2 + $0x3]]  ;;  %s1202_s22 = sld [smem:[#allocation2 + $0x4]] }
  0x36   : > { %v344_v11 = vsel %vm341_vm1, %v342_v7, %v1130_v5  ;;  %v364_v12 = vsel %vm341_vm1, 0.0, %v342_v7  ;;  %v1151_v14 = vrot.slane %v1138_v8, %v281_v6  ;;  %v286_v15 = vrot.slane %v1138_v8, 1  ;;  %s1200_s21 = sld [smem:[#allocation4 + $0x3]]  ;;  %s1211_s23 = sld [smem:[#allocation4 + $0x4]] }
  0x37   : > { %v365_v16 = vadd.f32 %v364_v12, %v326_v4  ;;  %v366_v17 = vadd.f32 %v344_v11, %v308_v2  ;;  %v439_v21 = vstv %s1126_s7  ;;  %v385_v23 = vrot.slane %v1146_v13, 4  ;;  %s268_s26 = scalar_lea.vmem %s1390_s3, %s1132_s8  ;;  %s276_s29 = scalar_lea.vmem %s1391_s4, %s1132_s8 }
  0x38   : > { %v283_v18 = vsub.f32 %v1138_v8, %v1151_v14  ;;  %v284_v19 = vsub.f32 %v1140_v9, %v1151_v14  ;;  %v288_v20 = vsub.f32 %v1140_v9, %v286_v15  ;;  %v440_v28 = vmul.f32 %v439_v21, %v1138_v8 }
  0x39   : > { %v382_v22 = vrot.slane %v365_v16, 4  ;;  %v383_v27 = vrot.slane %v366_v17, 4  ;;  %v441_v29 = vmul.f32 %v439_v21, %v1140_v9  ;;  %v443_v37 = vstv %s1148_s12 }
  0x3a   : > { %v292_v24 = vrot.slane %v288_v20, %v291_v10  ;;  %v296_v25 = vrot.slane %v283_v18, 7  ;;  %v297_v26 = vrot.slane %v284_v19, 7  ;;  %v1186_v51 = vadd.f32 %v443_v37, %v440_v28 }
  0x3b   : > { %v384_v39 = vsel %vm381_vm2, %v382_v22, %v383_v27  ;;  %v386_v40 = vsel %vm381_vm2, %v383_v27, %v385_v23  ;;  %v405_v41 = vsel %vm381_vm2, 0.0, %v382_v22  ;;  %v1188_v52 = vadd.f32 %v443_v37, %v441_v29 }
  0x3c   : > { %v298_v30 = vsel %vm295_vm0, %v296_v25, %v297_v26  ;;  %v303_v31 = vsel %vm295_vm0, 0.0, %v296_v25  ;;  %v304_v32 = vsel %vm295_vm0, %v297_v26, %v292_v24  ;;  %v316_v33 = vrot.slane %v292_v24, 7 }
  0x3d   : > { %v310_v34 = vrot.slane %v303_v31, 7  ;;  %v312_v35 = vrot.slane %v298_v30, 7  ;;  %v314_v36 = vrot.slane %v304_v32, 7  ;;  %v447_v53 = vstv %s1161_s13 }
  0x3e   : > { %v333_v38 = vadd.f32 %v316_v33, %v292_v24  ;;  %v1191_v58 = vadd.f32 %v405_v41, %v365_v16  ;;  %v407_v59 = vadd.f32 %v384_v39, %v366_v17  ;;  %v408_v60 = vadd.f32 %v386_v40, %v1146_v13 }
  0x3f   : > { %v311_v42 = vsel %vm295_vm0, %v308_v2, %v310_v34  ;;  %v313_v43 = vsel %vm295_vm0, %v310_v34, %v312_v35  ;;  %v315_v44 = vsel %vm295_vm0, %v312_v35, %v314_v36  ;;  %v317_v45 = vsel %vm295_vm0, %v314_v36, %v316_v33 }
  0x40   : > { %v329_v46 = vadd.f32 %v311_v42, %v303_v31  ;;  %v330_v47 = vadd.f32 %v313_v43, %v298_v30  ;;  %v331_v48 = vadd.f32 %v315_v44, %v304_v32  ;;  %v332_v49 = vadd.f32 %v317_v45, %v292_v24 }
  0x41   : > { %v354_v50 = vrot.slane %v333_v38, 6  ;;  %v455_v61 = vstv %s1165_s14  ;;  %v448_v10 = vmul.f32 %v447_v53, %v1138_v8  ;;  %v449_v11 = vmul.f32 %v447_v53, %v1140_v9 }
  0x42   : > { %v346_v54 = vrot.slane %v329_v46, 6  ;;  %v348_v55 = vrot.slane %v330_v47, 6  ;;  %v350_v56 = vrot.slane %v331_v48, 6  ;;  %v352_v57 = vrot.slane %v332_v49, 6 }
  0x43   : > { %v451_v17 = vstv %s1180_s15  ;;  %v416_v18 = vadd.f32 %v408_v60, %v407_v59  ;;  %v456_v19 = vmul.f32 %v455_v61, %v1138_v8  ;;  %v459_v20 = vstv %s1182_s18 }
  0x44   : > { %v347_v62 = vsel %vm341_vm1, %v1130_v5, %v346_v54  ;;  %v349_v63 = vsel %vm341_vm1, %v346_v54, %v348_v55  ;;  %v351_v0 = vsel %vm341_vm1, %v348_v55, %v350_v56  ;;  %v353_v1 = vsel %vm341_vm1, %v350_v56, %v352_v57 }
  0x45   : > { %v355_v2 = vsel %vm341_vm1, %v352_v57, %v354_v50  ;;  %v368_v3 = vadd.f32 %v347_v62, %v329_v46  ;;  %v369_v4 = vadd.f32 %v349_v63, %v330_v47  ;;  %v370_v6 = vadd.f32 %v351_v0, %v331_v48 }
  0x46   : > { %v371_v7 = vadd.f32 %v353_v1, %v332_v49  ;;  %v372_v5 = vadd.f32 %v355_v2, %v333_v38  ;;  %v463_v21 = vstv %s1184_s20  ;;  %v457_v26 = vmul.f32 %v455_v61, %v1140_v9 }
  0x47   : > { %v387_v12 = vrot.slane %v368_v3, 4  ;;  %v389_v15 = vrot.slane %v369_v4, 4  ;;  %v391_v16 = vrot.slane %v370_v6, 4  ;;  %v1219_v32 = vadd.f32 %v451_v17, %v448_v10 }
  0x48   : > { %v393_v27 = vrot.slane %v371_v7, 4  ;;  %v395_v28 = vrot.slane %v372_v5, 4  ;;  %v1221_v33 = vadd.f32 %v451_v17, %v449_v11  ;;  %v464_v13 = vmul.f32 %v463_v21, %v1138_v8 }
  0x49   : > { %v388_v22 = vsel %vm381_vm2, %v385_v23, %v387_v12  ;;  %v390_v24 = vsel %vm381_vm2, %v387_v12, %v389_v15  ;;  %v392_v25 = vsel %vm381_vm2, %v389_v15, %v391_v16  ;;  %v465_v23 = vmul.f32 %v463_v21, %v1140_v9 }
  0x4a   : > { %v409_v29 = vadd.f32 %v388_v22, %v368_v3  ;;  %v410_v30 = vadd.f32 %v390_v24, %v369_v4  ;;  %v411_v31 = vadd.f32 %v392_v25, %v370_v6  ;;  %v467_v35 = vstv %s1200_s21 }
  0x4b   : > { %v471_v36 = vstv %s1202_s22  ;;  %v1228_v37 = vadd.f32 %v407_v59, %v1191_v58  ;;  %v1230_v38 = vadd.f32 %v459_v20, %v456_v19  ;;  %v1232_v39 = vadd.f32 %v459_v20, %v457_v26 }
  0x4c   : > { %v418_v34 = vadd.f32 %v410_v30, %v409_v29  ;;  %v394_v40 = vsel %vm381_vm2, %v391_v16, %v393_v27  ;;  %v396_v41 = vsel %vm381_vm2, %v393_v27, %v395_v28  ;;  %v417_v42 = vadd.f32 %v409_v29, %v408_v60 }
  0x4d   : > { %v472_v43 = vmul.f32 %v471_v36, %v1138_v8  ;;  %v419_v44 = vadd.f32 %v411_v31, %v410_v30  ;;  %v1237_v46 = vadd.f32 %v467_v35, %v464_v13  ;;  %v473_v47 = vmul.f32 %v471_v36, %v1140_v9 }
  0x4e   : > { %v426_v45 = vadd.f32 %v418_v34, %v416_v18  ;;  %v1240_v48 = vadd.f32 %v467_v35, %v465_v23  ;;  %v475_v49 = vstv %s1211_s23  ;;  %v478_v50 = vmax.f32 %v1186_v51, %v1219_v32 }
  0x4f   : > { %v479_v53 = vmax.f32 %v1188_v52, %v1221_v33  ;;  %v412_v54 = vadd.f32 %v394_v40, %v371_v7  ;;  %v1248_v55 = vadd.f32 %v416_v18, %v1191_v58  ;;  %v1250_v56 = vadd.f32 %v475_v49, %v472_v43 }
  0x50   : > { %v1252_v57 = vadd.f32 %v475_v49, %v473_v47  ;;  %v480_v59 = vmax.f32 %v478_v50, %v1230_v38  ;;  %v413_v61 = vadd.f32 %v396_v41, %v372_v5  ;;  %v1257_v62 = vadd.f32 %v417_v42, %v1228_v37 }
  0x51   : > { %v481_v60 = vmax.f32 %v479_v53, %v1232_v39  ;;  %v427_v63 = vadd.f32 %v419_v44, %v417_v42  ;;  %v1260_v0 = vadd.f32 %v426_v45, %v1191_v58  ;;  %v490_v3 = vrot.slane %v1248_v55, 1 }
  0x52   : > { %v482_v1 = vmax.f32 %v480_v59, %v1237_v46  ;;  %v491_v4 = vrot.slane %v1257_v62, 1  ;;  %v420_v7 = vadd.f32 %v412_v54, %v411_v31  ;;  %v421_v11 = vadd.f32 %v413_v61, %v412_v54 }
  0x53   : > { %v483_v2 = vmax.f32 %v481_v60, %v1240_v48  ;;  %v493_v6 = vrot.slane %v1260_v0, 1  ;;  %v1274_v12 = vadd.f32 %v427_v63, %v1228_v37  ;;  %v529_v15 = vrot.slane %v1248_v55, 4 }
  0x54   : > { %v1268_v5 = vmax.f32 %v482_v1, %v1250_v56  ;;  %v530_v16 = vrot.slane %v1257_v62, 4  ;;  %v532_v19 = vrot.slane %v1260_v0, 4  ;;  %v492_v20 = vsel %vm489_vm3, %v490_v3, %v491_v4 }
  0x55   : > { %v1271_v10 = vmax.f32 %v483_v2, %v1252_v57  ;;  %v494_v21 = vsel %vm489_vm3, %v491_v4, %v493_v6  ;;  %v500_v22 = vsub.f32 %v1274_v12, %v493_v6  ;;  %v428_v24 = vadd.f32 %v420_v7, %v418_v34 }
  0x56   : > { %v507_v17 = vsub.f32 %v1186_v51, %v1268_v5  ;;  %v429_v27 = vadd.f32 %v421_v11, %v419_v44  ;;  %v531_v28 = vsel %vm381_vm2, %v529_v15, %v530_v16  ;;  %v546_v51 = vsub.f32 %v1219_v32, %v1268_v5 }
  0x57   : > { %v508_v18 = vsub.f32 %v1188_v52, %v1271_v10  ;;  %v580_v52 = vrot.slane %v1248_v55, 2  ;;  %v498_v29 = vsub.f32 %v1257_v62, %v492_v20  ;;  %v499_v30 = vsub.f32 %v1260_v0, %v494_v21 }
  0x58   : > { %v509_v25 = vmul.f32 1.442695, %v507_v17  ;;  %v533_v31 = vsel %vm381_vm2, %v530_v16, %v532_v19  ;;  %v547_v13 = vsub.f32 %v1221_v33, %v1271_v10  ;;  %v503_v34 = vmul.f32 0.14285715, %v500_v22 }
  0x59   : > { %v511_v26 = vmul.f32 1.442695, %v508_v18  ;;  %v548_v23 = vmul.f32 1.442695, %v546_v51  ;;  %v581_v35 = vrot.slane %v1257_v62, 2  ;;  %v583_v32 = vrot.slane %v1260_v0, 2 }
  0x5a   : > { %950 = vpow2.f32 %v509_v25  ;;  %v550_v36 = vmul.f32 1.442695, %v547_v13  ;;  %v597_v40 = vsub.f32 %v1230_v38, %v1268_v5  ;;  %v537_v41 = vsub.f32 %v1257_v62, %v529_v15 }
  0x5b   : > { %952 = vpow2.f32 %v511_v26  ;;  %v538_v42 = vsub.f32 %v1260_v0, %v531_v28  ;;  %v539_v43 = vsub.f32 %v1274_v12, %v533_v31  ;;  %v501_v33 = vmul.f32 0.14285715, %v498_v29 }
  0x5c   : > { %954 = vpow2.f32 %v548_v23  ;;  %v598_v44 = vsub.f32 %v1232_v39, %v1271_v10  ;;  %v599_v45 = vmul.f32 1.442695, %v597_v40  ;;  %v1305_v47 = vadd.f32 %v428_v24, %v1248_v55 }
  0x5d   : > { %956 = vpow2.f32 %v550_v36  ;;  %v1308_v49 = vadd.f32 %v429_v27, %v1257_v62  ;;  %v502_v38 = vmul.f32 0.14285715, %v499_v30  ;;  %v588_v50 = vsub.f32 %v1257_v62, %v580_v52 }
  0x5e   : > { %v582_v53 = vsel %vm554_vm4, %v580_v52, %v581_v35  ;;  %v584_v54 = vsel %vm554_vm4, %v581_v35, %v583_v32  ;;  %958 = vpow2.f32 %v599_v45  ;;  %v601_v59 = vmul.f32 1.442695, %v598_v44 }
  0x5f   : > { %v540_v60 = vmul.f32 0.083333336, %v537_v41  ;;  %v541_v61 = vmul.f32 0.083333336, %v538_v42  ;;  %v542_v63 = vmul.f32 0.083333336, %v539_v43  ;;  %v640_v39 = vsub.f32 %v1237_v46, %v1268_v5 }
  0x60   : > { %v1316_v1 = vadd.f32 %v501_v33, %v1151_v14  ;;  %v1319_v2 = vadd.f32 %v503_v34, %v1151_v14  ;;  %960 = vpow2.f32 %v601_v59  ;;  %v641_v3 = vsub.f32 %v1240_v48, %v1271_v10 }
  0x61   : > { %v589_v4 = vsub.f32 %v1260_v0, %v582_v53  ;;  %v590_v6 = vsub.f32 %v1274_v12, %v584_v54  ;;  %v591_v7 = vmul.f32 0.071428575, %v588_v50  ;;  %v642_v11 = vmul.f32 1.442695, %v640_v39 }
  0x62   : > { %v505_v15 = vadd.f32 %v502_v38, %v1151_v14  ;;  %v644_v16 = vmul.f32 1.442695, %v641_v3  ;;  %v668_v46 = vsub.f32 %v1250_v56, %v1268_v5  ;;  %v669_v17 = vsub.f32 %v1252_v57, %v1271_v10 }
  0x63   : > { %v543_v19 = vadd.f32 %v540_v60, %v1151_v14  ;;  %v544_v48 = vadd.f32 %v541_v61, %v1151_v14  ;;  %v545_v20 = vadd.f32 %v542_v63, %v1151_v14  ;;  %962 = vpow2.f32 %v642_v11 }
  0x64   : > { %v951_v18 = vpop.eup %950  ;;  %v631_v22 = vsub.f32 %v1260_v0, %v1228_v37  ;;  %964 = vpow2.f32 %v644_v16  ;;  %v670_v24 = vmul.f32 1.442695, %v668_v46  ;;  %v672_v25 = vmul.f32 1.442695, %v669_v17 }
  0x65   : > { %v953_v21 = vpop.eup %952  ;;  %v592_v56 = vmul.f32 0.071428575, %v589_v4  ;;  %v593_v5 = vmul.f32 0.071428575, %v590_v6  ;;  %v594_v57 = vadd.f32 %v591_v7, %v1151_v14  ;;  %v632_v10 = vsub.f32 %v1274_v12, %v1248_v55 }
  0x66   : > { %v955_v26 = vpop.eup %954  ;;  %v633_v51 = vsub.f32 %v1305_v47, %v1257_v62  ;;  %v662_v52 = vsub.f32 %v1305_v47, %v1191_v58  ;;  %v663_v0 = vsub.f32 %v1308_v49, %v1228_v37  ;;  %v515_v29 = vrot.slane %v951_v18, 4 }
  0x67   : > { %v957_v27 = vpop.eup %956  ;;  %v555_v28 = vrot.slane %v955_v26, 2  ;;  %v516_v30 = vrot.slane %v953_v21, 4  ;;  %966 = vpow2.f32 %v670_v24  ;;  %v578_v23 = vadd.f32 %v955_v26, %v951_v18 }
  0x68   : > { %v556_v31 = vrot.slane %v957_v27, 2  ;;  %v959_v13 = vpop.eup %958  ;;  %v579_v35 = vadd.f32 %v957_v27, %v953_v21  ;;  %968 = vpow2.f32 %v672_v25  ;;  %v596_v62 = vadd.f32 %v593_v5, %v1151_v14 }
  0x69   : > { %v561_v34 = vmul.f32 %v555_v28, %v543_v19  ;;  %v605_v36 = vrot.slane %v959_v13, 1  ;;  %v595_v37 = vadd.f32 %v592_v56, %v1151_v14  ;;  %v634_v40 = vmul.f32 0.041666668, %v631_v22 }
  0x6a   : > { %v557_v55 = vsel %vm554_vm4, %v555_v28, %v556_v31  ;;  %v563_v12 = vmul.f32 %v556_v31, %v545_v20  ;;  %v961_v58 = vpop.eup %960  ;;  %v664_v41 = vmul.f32 0.020833334, %v662_v52  ;;  %v517_v42 = vsel %vm381_vm2, %v515_v29, %v516_v30 }
  0x6b   : > { %v562_v32 = vmul.f32 %v557_v55, %v544_v48  ;;  %v606_v43 = vrot.slane %v961_v58, 1  ;;  %v611_v33 = vmul.f32 %v605_v36, %v594_v57  ;;  %v665_v44 = vmul.f32 0.020833334, %v663_v0 }
  0x6c   : > { %v567_v45 = vrot.slane %v561_v34, 2  ;;  %v629_v49 = vadd.f32 %v959_v13, %v578_v23  ;;  %v630_v38 = vadd.f32 %v961_v58, %v579_v35  ;;  %v570_v53 = vrot.slane %v563_v12, 2 }
  0x6d   : > { %v568_v47 = vrot.slane %v562_v32, 2  ;;  %v963_v50 = vpop.eup %962  ;;  %v607_v54 = vsel %vm489_vm3, %v605_v36, %v606_v43  ;;  %v613_v59 = vmul.f32 %v606_v43, %v596_v62  ;;  %v635_v60 = vmul.f32 0.041666668, %v632_v10 }
  0x6e   : > { %v965_v61 = vpop.eup %964  ;;  %v521_v63 = vmul.f32 %v515_v29, %v1316_v1  ;;  %v612_v39 = vmul.f32 %v607_v54, %v595_v37  ;;  %v636_v3 = vmul.f32 0.041666668, %v633_v51  ;;  %v666_v4 = vadd.f32 %v664_v41, %v1151_v14 }
  0x6f   : > { %v522_v6 = vmul.f32 %v517_v42, %v505_v15  ;;  %v523_v7 = vmul.f32 %v516_v30, %v1319_v2  ;;  %v618_v11 = vrot.slane %v611_v33, 3  ;;  %v667_v16 = vadd.f32 %v665_v44, %v1151_v14 }
  0x70   : > { %v569_v46 = vsel %vm554_vm4, %v567_v45, %v568_v47  ;;  %v619_v17 = vrot.slane %v612_v39, 3  ;;  %v660_v18 = vadd.f32 %v963_v50, %v629_v49  ;;  %v661_v19 = vadd.f32 %v965_v61, %v630_v38 }
  0x71   : > { %v967_v48 = vpop.eup %966  ;;  %v571_v20 = vsel %vm554_vm4, %v568_v47, %v570_v53  ;;  %v621_v21 = vrot.slane %v613_v59, 3  ;;  %v648_v1 = vrot.slane %v963_v50, 4  ;;  %v649_v22 = vrot.slane %v965_v61, 4 }
  0x72   : > { %v969_v24 = vpop.eup %968  ;;  %v637_v25 = vadd.f32 %v634_v40, %v1151_v14  ;;  %v575_v15 = vadd.f32 %v569_v46, %v521_v63  ;;  %v577_v26 = vadd.f32 %v570_v53, %v523_v7  ;;  %v638_v2 = vadd.f32 %v635_v60, %v1151_v14 }
  0x73   : > { %v639_v56 = vadd.f32 %v636_v3, %v1151_v14  ;;  %v576_v5 = vadd.f32 %v571_v20, %v522_v6  ;;  %v620_v57 = vsel %vm617_vm5, %v618_v11, %v619_v17  ;;  %v687_v10 = vadd.f32 %v967_v48, %v660_v18 }
  0x74   : > { %v688_v27 = vadd.f32 %v969_v24, %v661_v19  ;;  %v622_v28 = vsel %vm617_vm5, %v619_v17, %v621_v21  ;;  %v650_v51 = vsel %vm381_vm2, %v648_v1, %v649_v22  ;;  %v674_v52 = vmul.f32 %v967_v48, %v666_v4 }
  0x75   : > { %v675_v0 = vmul.f32 %v969_v24, %v667_v16  ;;  %v691_v29 = vrot.slane %v687_v10, 4  ;;  %v626_v31 = vadd.f32 %v620_v57, %v575_v15  ;;  %v628_v13 = vadd.f32 %v621_v21, %v577_v26 }
  0x76   : > { %v692_v30 = vrot.slane %v688_v27, 4  ;;  %v654_v34 = vmul.f32 %v648_v1, %v637_v25  ;;  %v627_v23 = vadd.f32 %v622_v28, %v576_v5  ;;  %v655_v35 = vmul.f32 %v650_v51, %v638_v2 }
  0x77   : > { %970 = vrcp.f32 %v691_v29  ;;  %v656_v55 = vmul.f32 %v649_v22, %v639_v56  ;;  %v678_v12 = vrot.slane %v674_v52, 4  ;;  %v679_v62 = vrot.slane %v675_v0, 4 }
  0x78   : > { %v693_v14 = vsel %vm381_vm2, %v691_v29, %v692_v30  ;;  %v657_v36 = vadd.f32 %v654_v34, %v626_v31  ;;  %v658_v58 = vadd.f32 %v655_v35, %v627_v23 }
  0x79   : > { %972 = vrcp.f32 %v693_v14  ;;  %v659_v32 = vadd.f32 %v656_v55, %v628_v13  ;;  %v680_v37 = vsel %vm381_vm2, %v678_v12, %v679_v62 }
  0x7a   : > { %974 = vrcp.f32 %v692_v30  ;;  %v684_v40 = vadd.f32 %v678_v12, %v657_v36  ;;  %v685_v41 = vadd.f32 %v680_v37, %v658_v58 }
  0x7b   : > { %v686_v42 = vadd.f32 %v679_v62, %v659_v32 }
  0x81   : > { %v971_v43 = vpop.eup %970 }
  0x82   : > { %v698_v44 = vmul.f32 %v971_v43, %v684_v40 }
  0x83   : > { %v973_v33 = vpop.eup %972 }
  0x84   : > { %v975_v45 = vpop.eup %974  ;;  %v700_v47 = vmul.f32 %v973_v33, %v685_v41  ;;  %704 = vst.msk [vmem:[%s268_s26 - $0x4] sm:$0xf0] %vm703_vm6, %v698_v44  ;;  %v712_v38 = vrot.slane %v698_v44, 4 }
  0x85   : > { %v702_v49 = vmul.f32 %v975_v45, %v686_v42 }
  0x86   : > { %706 = vst.msk [vmem:[%s268_s26 + $0x4] sm:$0xff] %vm705_vm7, %v700_v47  ;;  %v713_v50 = vrot.slane %v700_v47, 4 }
  0x87   : > { %708 = vst.msk [vmem:[%s268_s26 + $0xc] sm:$0xf] %vm707_vm8, %v702_v49  ;;  %v715_v53 = vrot.slane %v702_v49, 4 }
  0x88   : > { %v714_v54 = vsel %vm381_vm2, %v712_v38, %v713_v50 }
  0x89   : > { %v716_v59 = vsel %vm381_vm2, %v713_v50, %v715_v53  ;;  %v719_v60 = vsub.f32 %v1138_v8, %v714_v54 }
  0x8a   : > { %v720_v61 = vsub.f32 %v1140_v9, %v716_v59 }
  0x8b   : > { %721 = vst.msk [vmem:[%s276_s29] sm:$0xff] %vm705_vm7, %v719_v60 }
  0x8c   : > { %722 = vst.msk [vmem:[%s276_s29 + $0x8] sm:$0xff] %vm705_vm7, %v720_v61 }
  0x8d PF: > { %s17_s17 = sadd.s32 1, %s1036_s17   ;;  %s1400_s15 = smov %s1032_s16 }
  0x8e   : > { %p14_p4 = scmp.ge.s32.totalorder %s17_s17, 4   ;;  %s1401_s16 = smov %s1403_s19 }
  0x90   :  { %16 = sbr.rel (!%p14_p4) target bundleno = 3 (0x3), region = 83 }
  0x97   :  { %772 = vsyncpa [#allocation3], 1 }
  0x98   :  { %774 = vsyncpa [#allocation3 + $0x1], 1 }
  0x99   :  { %775 = vsyncpa [#allocation5], 1 }

</bundles_post_ra>
